<compile_context>
chip_gen: v6e
topology: v6e:2x2x1
jax: 0.10.0
libtpu: 0.0.40
codegen_flags: <defaults>
</compile_context>

<pallas_src>
import math
import jax
import jax.numpy as jnp
from jax import lax
from jax.experimental import pallas as pl
from jax.experimental.pallas import tpu as pltpu


# --------------------------------------------------------------------------
# Pallas kernel: one MXU matmul per grid step on a lane-dense im2col tile.
# --------------------------------------------------------------------------
def _matmul_kernel(w_ref, s_ref, o_ref):
    # w_ref: (Cout, KKC)   folded conv weight, same block every step (resident)
    # s_ref: (KKC, TL)     lane-dense im2col slab tile
    # o_ref: (Cout, TL)    lane-dense output tile
    o_ref[...] = jnp.dot(
        w_ref[...], s_ref[...], preferred_element_type=jnp.float32
    ).astype(o_ref.dtype)


def _pick_lane_block(L, max_lanes=8192):
    """Pick the lane-axis tile size (multiple of 128 when it matters)."""
    if L > max_lanes:
        return max_lanes            # multiple of 128; trailing partial block is masked
    if L >= 512 and L % 256 == 0:
        return L // 2               # >= 2 grid steps (keeps both v7x TCs busy)
    return L                        # single full-extent block (always layout-legal)


def conv2d_pallas(x, weight, *, padding=2, compute_dtype=None):
    """x: (N, Cin, H, W); weight: (Cout, Cin, K, K); stride=1, dilation=1, groups=1."""
    N, Cin, H, W = x.shape
    Cout, Cin_w, K, K2 = weight.shape
    assert Cin == Cin_w and K == K2
    Hp, Wp = H + 2 * padding, W + 2 * padding
    Ho, Wo = Hp - K + 1, Wp - K + 1
    KKC = Cin * K * K
    L = N * Ho * Wo

    if compute_dtype is None:
        compute_dtype = x.dtype     # bf16 here halves DMA bytes if tolerances allow

    # --- glue (wrapper, runs once under XLA): pad + lane-dense im2col slab ---
    x_pad = jnp.pad(x, ((0, 0), (0, 0), (padding, padding), (padding, padding)))
    taps = [x_pad[:, :, kh:kh + Ho, kw:kw + Wo]              # each (N, Cin, Ho, Wo)
            for kh in range(K) for kw in range(K)]
    slab = jnp.stack(taps, axis=2)                           # (N, Cin, K*K, Ho, Wo)
    slab = slab.transpose(1, 2, 0, 3, 4).reshape(KKC, L)     # row = cin*K*K + kh*K + kw
    slab = slab.astype(compute_dtype)
    w_mat = weight.reshape(Cout, KKC).astype(compute_dtype)  # same row ordering

    TL = _pick_lane_block(L)
    grid = (pl.cdiv(L, TL),)

    out_flat = pl.pallas_call(
        _matmul_kernel,
        out_shape=jax.ShapeDtypeStruct((Cout, L), x.dtype),
        grid_spec=pltpu.PrefetchScalarGridSpec(
            num_scalar_prefetch=0,
            grid=grid,
            in_specs=[
                pl.BlockSpec((Cout, KKC), lambda i: (0, 0)),   # weight (resident)
                pl.BlockSpec((KKC, TL), lambda i: (0, i)),     # slab tile (lane-dense)
            ],
            out_specs=pl.BlockSpec((Cout, TL), lambda i: (0, i)),
        ),
        compiler_params=pltpu.CompilerParams(
            dimension_semantics=("parallel",)),
    )(w_mat, slab)

    # (Cout, N*Ho*Wo) -> (N, Cout, Ho, Wo)
    return out_flat.reshape(Cout, N, Ho, Wo).transpose(1, 0, 2, 3)


# --------------------------------------------------------------------------
# Radial-difference weight construction (torch Conv2d_rd semantics).
# --------------------------------------------------------------------------
def make_rd_weight(w3, theta):
    """Build the 5x5 radial-difference weight from the 3x3 conv weight."""
    Cout, Cin, _, _ = w3.shape
    w3f = w3.reshape(Cout, Cin, 9)
    w_rd = jnp.zeros((Cout, Cin, 25), w3.dtype)
    ring = jnp.array([0, 2, 4, 10, 14, 20, 22, 24])
    inner = jnp.array([6, 7, 8, 11, 13, 16, 17, 18])
    w_rd = w_rd.at[:, :, ring].set(w3f[:, :, 1:])
    w_rd = w_rd.at[:, :, inner].set(-w3f[:, :, 1:] * theta)
    w_rd = w_rd.at[:, :, 12].set(w3f[:, :, 0] * (1.0 - theta))
    return w_rd.reshape(Cout, Cin, 5, 5)


class Conv2dRD:
    """JAX/Pallas port of Conv2d_rd (kernel_size=3, stride=1, padding=2,
    dilation=1, groups=1, bias=False)."""

    def __init__(self, in_channels, out_channels, key, theta=1.0, padding=2):
        self.theta = float(theta)
        self.padding = padding
        # deterministic kaiming-uniform-like init (nn.Conv2d default bound = 1/sqrt(fan_in))
        fan_in = in_channels * 3 * 3
        bound = 1.0 / math.sqrt(fan_in)
        self.weight = jax.random.uniform(
            key, (out_channels, in_channels, 3, 3),
            minval=-bound, maxval=bound, dtype=jnp.float32)

    def __call__(self, x):
        if math.fabs(self.theta - 0.0) < 1e-8:
            # theta == 0 branch: plain 3x3 conv with padding=2
            # (output spatial = H+2, W+2 — matches the torch module's semantics).
            return conv2d_pallas(x, self.weight, padding=self.padding)
        # default branch (theta=1.0): 5x5 radial-difference conv, padding=2
        w_rd = make_rd_weight(self.weight, self.theta)
        return conv2d_pallas(x, w_rd, padding=self.padding)


if __name__ == "__main__":
    key = jax.random.PRNGKey(0)
    kx, kw = jax.random.split(key)

    N, Cin, H, W = 2, 4, 16, 16
    Cout = 8
    x = jax.random.normal(kx, (N, Cin, H, W), dtype=jnp.float32)

    # --- theta = 1.0 (radial-difference 5x5) path ---
    mod = Conv2dRD(Cin, Cout, kw, theta=1.0)
    out = jax.block_until_ready(mod(x))
    w_rd = make_rd_weight(mod.weight, mod.theta)
    ref = lax.conv_general_dilated(
        x, w_rd, window_strides=(1, 1), padding=((2, 2), (2, 2)),
        dimension_numbers=("NCHW", "OIHW", "NCHW"))
    assert out.shape == (N, Cout, H, W), out.shape
    assert jnp.allclose(out, ref, atol=1e-4, rtol=1e-4), float(jnp.max(jnp.abs(out - ref)))

    # --- theta = 0.0 (plain 3x3 conv, padding=2 -> H+2 x W+2 output) path ---
    mod0 = Conv2dRD(Cin, Cout, kw, theta=0.0)
    out0 = jax.block_until_ready(mod0(x))
    ref0 = lax.conv_general_dilated(
        x, mod0.weight, window_strides=(1, 1), padding=((2, 2), (2, 2)),
        dimension_numbers=("NCHW", "OIHW", "NCHW"))
    assert out0.shape == (N, Cout, H + 2, W + 2), out0.shape
    assert jnp.allclose(out0, ref0, atol=1e-4, rtol=1e-4), float(jnp.max(jnp.abs(out0 - ref0)))

    print("KERNEL_OK")
</pallas_src>

<mosaic_0001>
module attributes {stable_mosaic.version = 11 : i64} {
  func.func @_matmul_kernel(%arg0: i32, %arg1: memref<8x100xf32, #tpu.memory_space<vmem>>, %arg2: memref<100x256xf32, #tpu.memory_space<vmem>>, %arg3: memref<8x256xf32, #tpu.memory_space<vmem>>) attributes {dimension_semantics = [#tpu.dimension_semantics<parallel>], iteration_bounds = array<i64: 2>, scalar_prefetch = 0 : i64, scratch_operands = 0 : i64, tpu.core_type = #tpu.core_type<tc>, window_params = [{pipeline_mode = #tpu.pipeline_mode<synchronous>, transform_indices = @transform_0, window_bounds = array<i64: 8, 100>}, {transform_indices = @transform_1, window_bounds = array<i64: 100, 256>}, {transform_indices = @transform_2, window_bounds = array<i64: 8, 256>}]} {
    %c0 = arith.constant 0 : index
    %c0_0 = arith.constant 0 : index
    %0 = vector.load %arg1[%c0, %c0_0] : memref<8x100xf32, #tpu.memory_space<vmem>>, vector<8x100xf32>
    %c0_1 = arith.constant 0 : index
    %c0_2 = arith.constant 0 : index
    %1 = vector.load %arg2[%c0_1, %c0_2] : memref<100x256xf32, #tpu.memory_space<vmem>>, vector<100x256xf32>
    %cst = arith.constant dense<0.000000e+00> : vector<8x256xf32>
    %2 = tpu.matmul %0, %1, %cst {dimension_numbers = #tpu.dot_dimension_numbers<[1], [0], [0], [1], [0, 0, 1, 1], [], []>} : vector<8x100xf32>, vector<100x256xf32>, vector<8x256xf32> -> vector<8x256xf32>
    %c0_3 = arith.constant 0 : index
    %c0_4 = arith.constant 0 : index
    %3 = vector.load %arg3[%c0_3, %c0_4] : memref<8x256xf32, #tpu.memory_space<vmem>>, vector<8x256xf32>
    tpu.vector_store %arg3[%c0_3, %c0_4], %2 {strides = array<i32>} : memref<8x256xf32, #tpu.memory_space<vmem>>, vector<8x256xf32>,
    return
  }
  func.func @transform_0(%arg0: i32) -> (i32, i32) {
    %c0_i32 = arith.constant 0 : i32
    %c0_i32_0 = arith.constant 0 : i32
    %c0_i32_1 = arith.constant 0 : i32
    return %c0_i32, %c0_i32_0 : i32, i32
  }
  func.func @transform_1(%arg0: i32) -> (i32, i32) {
    %c0_i32 = arith.constant 0 : i32
    %c0_i32_0 = arith.constant 0 : i32
    return %c0_i32, %arg0 : i32, i32
  }
  func.func @transform_2(%arg0: i32) -> (i32, i32) {
    %c0_i32 = arith.constant 0 : i32
    %c0_i32_0 = arith.constant 0 : i32
    return %c0_i32, %arg0 : i32, i32
  }
}

</mosaic_0001>

<bundles_post_ra>
// kernel: tpu_custom_call.1
= control target key start
LH: loop header
LB: loop body
LE: loop exit
PB: predicated region body
PF: predicated region fallthrough
CT: control target
= control target key end

     0   :  { %7 = vsyncpa [#allocation3], 0  ;;  %s815_s0 = inlined_call_operand.hbm [shape: f32[8,100], index: 0, kind: input, shape index: {}]   ;;  %s816_s1 = inlined_call_operand.hbm [shape: f32[100,512], index: 1, kind: input, shape index: {}]   ;;  %s817_s2 = inlined_call_operand.hbm [shape: f32[8,512], index: 2, kind: output, shape index: {}]  }
   0x1   :  { %8 = vsyncpa [#allocation6], 0 }
   0x2   :  { %10 = vsyncpa [#allocation6 + $0x1], 0 }
   0x3   :  { %11 = vsyncpa [#allocation4], 0 }
   0x4   :  { %13 = vsyncpa [#allocation4 + $0x1], 0  ;;  %s613_s9 = smov 0   ;;  %s615_s10 = smov 0  }
   0x5   :  { %s617_s11 = smov 0   ;;  %s619_s12 = smov 0  }
   0x6 LB: > { %s634_s13 = sadd.s32 4294967295, %s589_s12   ;;  %s385_s14 = sadd.s32 4294967294, %s589_s12   ;;  %s589_s12 = sphi %s619_s12, %s840_s12   ;;  %s585_s11 = sphi %s617_s11, %s839_s11   ;;  %s581_s10 = sphi %s615_s10, %s838_s10   ;;  %s577_s9 = sphi %s613_s9, %s837_s9  }
   0x7   : > { %s638_s15 = sadd.s32 1, %s589_s12   ;;  %s47_s16 = sadd.s32 1, %s585_s11 }
   0x8   : > { %s44_s17 = ssub.s32 %s589_s12, %s638_s15  ;;  %p54_p0 = scmp.ne.s32.totalorder %s585_s11, %s581_s10 }
   0x9   : > { %p45_p1 = scmp.eq.s32.totalorder %s44_s17, 0  ;;  %p55_p2 = scmp.eq.s32.totalorder %s589_s12, 0 }
   0xa   : > { %p60_p3 = scmp.ne.s32.totalorder %s581_s10, %s577_s9  ;;  %p818_p4 = scmp.eq.s32.totalorder %s634_s13, 0 }
   0xb   : > { %s650_s18 = scalar_select %p45_p1, %s585_s11, %s47_s16  }
   0xc   : > { %p652_p5 = por %p55_p2, %p54_p0  ;;  %p658_p6 = por %p818_p4, %p60_p3 }
   0xd   : > { %p84_p7 = scmp.eq.s32.totalorder %s634_s13, 1  ;;  %p90_p8 = scmp.eq.s32.totalorder %s385_s14, 1 }
   0xe   : > { %s823_s20 = scalar_select %p658_p6, 1, 0 }
   0xf   : > { %p386_p9 = scmp.ge.s32.totalorder %s589_s12, 1  ;;  %p97_p10 = scmp.lt.s32.totalorder %s589_s12, 3 }
  0x10   : > { %p665_p11 = por %p84_p7, %p54_p0  ;;  %p669_p12 = por %p90_p8, %p60_p3 }
  0x11   : > { %p673_p13 = pnand %p386_p9, %p97_p10  ;;  %s591_s24 = smov [#allocation2]  }
  0x12   : > { %s824_s21 = scalar_select %p665_p11, 1, 0 }
  0x13   : > { %s825_s22 = scalar_select %p669_p12, 1, 0 }
  0x14   : > { %s826_s23 = scalar_select %p673_p13, 1, 0 }
  0x15   : > { %p414_p2 = pneg %p673_p13  ;;  %s110_s25 = sshll.u32 %s591_s24, 4  ;;  %s111_s25 = int_to_ptr.vmem [resolvable:$true] %s110_s25 }
  0x16   : > { %p427_p4 = scmp.lt.s32.totalorder %s589_s12, 2  ;;  %p827_p0 = scmp.eq.s32.totalorder %s634_s13, 0 }
  0x17   : > { %s121_s27 = sand.u32 1, %s585_s11   ;;  %s478_s30 = scalar_lea.vmem %s111_s25, 128 }
  0x18   : > { %p683_p7 = pnand %p414_p2, %p827_p0  ;;  %p690_p3 = pnand %p427_p4, %p652_p5 }
  0x19   : > { %s404_s29 = smul.u32 208, %s121_s27  ;;  %p479_p9 = scmp.ne.s32.totalorder %s111_s25, %s478_s30 }
  0x1a   : > { %p469_p8 = pneg %p683_p7  ;;  %p486_p12 = scmp.lt.s32.totalorder %s111_s25, %s111_s25 }
  0x1b   : > { %p487_p11 = scmp.lt.s32.totalorder %s478_s30, %s478_s30 }
  0x1c   : > { %p481_p10 = pnand %p479_p9, %p469_p8 }
  0x1d   : > { %p488_p2 = por %p487_p11, %p486_p12 }
  0x1e   : > { %p482_p1 = pneg %p481_p10 }
  0x20   : > { %p489_p0 = pnand %p488_p2, %p482_p1 }
  0x22   : > { %492 = shalt.err (!%p489_p0)
}
  0x23   : > { %417 = dma.hbm_to_vmem [thread:$0]  (!%p683_p7), %s815_s0, 128, %s111_s25, [#allocation3]  }
  0x24   : > { %s402_s5 = sshll.u32 %s589_s12, 8  ;;  %s125_s6 = scalar_lea.vmem [#allocation5], %s404_s29 }
  0x25   : > { %s132_s7 = sshll.u32 %s125_s6, 4  ;;  %s705_s16 = scalar_lea.hbm %s816_s1, %s402_s5  ;;  %s707_s7 = int_to_ptr.vmem [resolvable:$true] %s132_s7 }
  0x26   : > { %s709_s17 = scalar_lea.sflag [#allocation6], %s121_s27  ;;  %s493_s19 = scalar_lea.hbm %s705_s16, 3328 }
  0x27   : > { %p494_p4 = scmp.ne.s32.totalorder %s705_s16, %s493_s19  ;;  %p495_p5 = pneg %p690_p3 }
  0x28   : > { %s498_s26 = scalar_lea.hbm %s816_s1, 6656  ;;  %p499_p1 = scmp.lt.s32.totalorder %s705_s16, %s816_s1 }
  0x29   : > { %p496_p11 = pnand %p495_p5, %p494_p4  ;;  %p500_p7 = scmp.lt.s32.totalorder %s498_s26, %s493_s19 }
  0x2b   : > { %p497_p12 = pneg %p496_p11  ;;  %p501_p8 = por %p500_p7, %p499_p1 }
  0x2d   : > { %p502_p9 = pnand %p501_p8, %p497_p12 }
  0x2f   : > { %505 = shalt.err (!%p502_p9)
}
  0x30   : > { %s506_s27 = scalar_lea.vmem %s707_s7, 3328  ;;  %s592_s3 = smov [#allocation5]  }
  0x31   : > { %p507_p10 = scmp.ne.s32.totalorder %s707_s7, %s506_s27  ;;  %s511_s4 = sshll.u32 %s592_s3, 4  ;;  %s512_s4 = int_to_ptr.vmem [resolvable:$false] %s511_s4 }
  0x32   : > { %s513_s5 = scalar_lea.vmem %s512_s4, 6656  ;;  %p514_p4 = scmp.lt.s32.totalorder %s707_s7, %s512_s4 }
  0x33   : > { %p509_p2 = pnand %p507_p10, %p495_p5  ;;  %p515_p11 = scmp.lt.s32.totalorder %s513_s5, %s506_s27 }
  0x35   : > { %p510_p0 = pneg %p509_p2  ;;  %p516_p6 = por %p515_p11, %p514_p4 }
  0x37   : > { %p517_p13 = pnand %p516_p6, %p510_p0 }
  0x39   : > { %520 = shalt.err (!%p517_p13)
}
  0x3a   : > { %s593_s6 = smov 512   ;;  %s594_s8 = smov 256  }
  0x3b   : > { %s595_s14 = smov 16   ;;  %p830_p5 = scmp.ne.s32.totalorder %s826_s23, 0 }
  0x3c   : > { %421 = dma.hbm_to_vmem [thread:$0]  (!%p690_p3), %s705_s16, 3328, %s707_s7, %s709_s17, %s593_s6, %s594_s8, %s595_s14  }
  0x3d   : > { %144 = sbr.rel (%p830_p5) target bundleno = 307 (0x133), region = 28  ;;  %p831_p12 = scmp.eq.s32.totalorder (!%p830_p5), %s634_s13, 0 }
  0x42   : > { %564 = dma.done.wait (%p831_p12), [#allocation3], 128   ;;  %p832_p1 = pmov %p831_p12 }
  0x43   : > { %s737_s19 = sand.u32 1, %s581_s10   ;;  %p833_p6 = scmp.ne.s32.totalorder %s823_s20, 0 }
  0x44   : > { %566 = vsyncadd (%p832_p1), [#allocation3], 4294967168  ;;  %s405_s24 = smul.u32 208, %s737_s19  ;;  %s151_s25 = scalar_lea.sflag [#allocation6], %s737_s19 }
  0x46   : > { %s741_s26 = scalar_lea.vmem [#allocation5], %s405_s24 }
  0x47   : > { %568 = dma.done.wait (%p833_p6), %s151_s25, 3328  }
  0x48   : > { %570 = vsyncadd (%p833_p6), %s151_s25, 4294963968  ;;  %v596_v0 = vmov 0.0   ;;  %vm208_vm0 = vcmask 1043456   ;;  %v203_v1 = vld [vmem:[%s741_s26 + $0xc8] sm:$0xf]  ;;  %v201_v3 = vld [vmem:[%s741_s26 + $0xb8] sm:$0xff] }
  0x49   : > { %279 = vmatprep.mubr.f32.mxu0 %v596_v0  ;;  %v202_v2 = vld [vmem:[%s741_s26 + $0xc0] sm:$0xf]  ;;  %394 = vmatprep.subr.msk.mxu0 %vm208_vm0, %v203_v1  ;;  %v200_v4 = vld [vmem:[%s741_s26 + $0xb0] sm:$0xff]  ;;  %v199_v5 = vld [vmem:[%s741_s26 + $0xa8] sm:$0xff]  ;;  %vm204_vm1 = vcmask 818176   ;;  %s393_s20 = sshll.u32 %s737_s19, 4 }
  0x4a   : > { %395 = vmatpush1.msk.msra.mxu0 %vm208_vm0, %v202_v2  ;;  %v198_v6 = vld [vmem:[%s741_s26 + $0xa0] sm:$0xff]  ;;  %v197_v7 = vld [vmem:[%s741_s26 + $0x98] sm:$0xff]  ;;  %v196_v8 = vld [vmem:[%s741_s26 + $0x90] sm:$0xff]  ;;  %s174_s23 = scalar_lea.vmem [#allocation7], %s393_s20  ;;  %s403_s7 = sshll.u32 %s634_s13, 8 }
  0x4b   : > { %223 = vmatprep.subr.mxu0 %v201_v3  ;;  %v195_v9 = vld [vmem:[%s741_s26 + $0x88] sm:$0xff]  ;;  %v194_v10 = vld [vmem:[%s741_s26 + $0x80] sm:$0xff]  ;;  %v193_v11 = vld [vmem:[%s741_s26 + $0x78] sm:$0xff]  ;;  %s303_s28 = sshll.u32 %s174_s23, 4  ;;  %s301_s29 = scalar_lea.hbm %s817_s2, %s403_s7  ;;  %s775_s28 = int_to_ptr.vmem [resolvable:$true] %s303_s28 }
  0x4c   : > { %224 = vmatpush1.msra.mxu0 %v200_v4  ;;  %v192_v12 = vld [vmem:[%s741_s26 + $0x70] sm:$0xff]  ;;  %v191_v13 = vld [vmem:[%s741_s26 + $0x68] sm:$0xff]  ;;  %v190_v14 = vld [vmem:[%s741_s26 + $0x60] sm:$0xff]  ;;  %s289_s30 = scalar_lea.sflag [#allocation4], %s737_s19  ;;  %s521_s27 = scalar_lea.vmem %s775_s28, 256 }
  0x4d   : > { %225 = vmatprep.subr.mxu0 %v199_v5  ;;  %v189_v15 = vld [vmem:[%s741_s26 + $0x58] sm:$0xff]  ;;  %v188_v16 = vld [vmem:[%s741_s26 + $0x50] sm:$0xff]  ;;  %v187_v17 = vld [vmem:[%s741_s26 + $0x48] sm:$0xff]  ;;  %p522_p13 = scmp.ne.s32.totalorder %s775_s28, %s521_s27  ;;  %p834_p3 = scmp.ne.s32.totalorder %s824_s21, 0 }
  0x4e   : > { %226 = vmatpush1.msra.mxu0 %v198_v6  ;;  %v186_v18 = vld [vmem:[%s741_s26 + $0x40] sm:$0xff]  ;;  %v185_v19 = vld [vmem:[%s741_s26 + $0x38] sm:$0xff]  ;;  %v184_v20 = vld [vmem:[%s741_s26 + $0x30] sm:$0xff]  ;;  %s597_s13 = smov [#allocation7]  }
  0x4f   : > { %227 = vmatprep.subr.mxu0 %v197_v7  ;;  %v183_v21 = vld [vmem:[%s741_s26 + $0x28] sm:$0xff]  ;;  %v182_v22 = vld [vmem:[%s741_s26 + $0x20] sm:$0xff]  ;;  %v181_v23 = vld [vmem:[%s741_s26 + $0x18] sm:$0xff]  ;;  %p523_p7 = pnand %p522_p13, %p834_p3  ;;  %s525_s3 = sshll.u32 %s597_s13, 4  ;;  %s526_s3 = int_to_ptr.vmem [resolvable:$false] %s525_s3 }
  0x50   : > { %228 = vmatpush1.msra.mxu0 %v196_v8  ;;  %v180_v24 = vld [vmem:[%s741_s26 + $0x10] sm:$0xff]  ;;  %v179_v25 = vld [vmem:[%s741_s26 + $0x8] sm:$0xff]  ;;  %v178_v26 = vld [vmem:[%s741_s26] sm:$0xff]  ;;  %s527_s4 = scalar_lea.vmem %s526_s3, 512  ;;  %p528_p9 = scmp.lt.s32.totalorder %s775_s28, %s526_s3 }
  0x51   : > { %229 = vmatprep.subr.mxu0 %v195_v9  ;;  %v177_v27 = vld [vmem:[#allocation2] sm:$0xff]  ;;  %p524_p8 = pneg %p523_p7  ;;  %p529_p10 = scmp.lt.s32.totalorder %s527_s4, %s521_s27 }
  0x52   : > { %230 = vmatpush1.msra.mxu0 %v194_v10 }
  0x53   : > { %231 = vmatprep.subr.mxu0 %v193_v11  ;;  %p530_p2 = por %p529_p10, %p528_p9 }
  0x54   : > { %232 = vmatpush1.msra.mxu0 %v192_v12 }
  0x55   : > { %233 = vmatprep.subr.mxu0 %v191_v13  ;;  %p531_p0 = pnand %p530_p2, %p524_p8 }
  0x56   : > { %234 = vmatpush1.msra.mxu0 %v190_v14 }
  0x57   : > { %235 = vmatprep.subr.mxu0 %v189_v15 }
  0x58   : > { %236 = vmatpush1.msra.mxu0 %v188_v16 }
  0x59   : > { %237 = vmatprep.subr.mxu0 %v187_v17 }
  0x5a   : > { %238 = vmatpush1.msra.mxu0 %v186_v18 }
  0x5b   : > { %239 = vmatprep.subr.mxu0 %v185_v19 }
  0x5c   : > { %240 = vmatpush1.msra.mxu0 %v184_v20 }
  0x5d   : > { %241 = vmatprep.subr.mxu0 %v183_v21 }
  0x5e   : > { %242 = vmatpush1.msra.mxu0 %v182_v22 }
  0x5f   : > { %243 = vmatprep.subr.mxu0 %v181_v23 }
  0x60   : > { %244 = vmatpush1.msra.mxu0 %v180_v24 }
  0x61   : > { %245 = vmatprep.subr.mxu0 %v179_v25 }
  0x62   : > { %246 = vmatpush1.msra.mxu0 %v178_v26 }
  0x63   : > { %396 = vmatmul.mubr.msk.f32.vlgmr.msra.gmra.mxu0 %vm204_vm1, %v177_v27 }
 0x123   : > { %v281_v28 = vpop.f32.mrf.mxu0 }
 0x124   : > { %286 = vst [vmem:[%s174_s23] sm:$0xff] %v281_v28 }
 0x125   : > { %v283_v29 = vpop.f32.mrf.mxu0 }
 0x126   : > { %287 = vst [vmem:[%s174_s23 + $0x8] sm:$0xff] %v283_v29 }
 0x127   : > { %534 = shalt.err (!%p531_p0)
}
 0x128   : > { %s535_s5 = scalar_lea.hbm %s301_s29, 256  ;;  %s539_s14 = scalar_lea.hbm %s817_s2, 512 }
 0x129   : > { %p536_p4 = scmp.ne.s32.totalorder %s301_s29, %s535_s5  ;;  %p540_p12 = scmp.lt.s32.totalorder %s301_s29, %s817_s2 }
 0x12a   : > { %p541_p1 = scmp.lt.s32.totalorder %s539_s14, %s535_s5 }
 0x12b   : > { %p537_p11 = pnand %p536_p4, %p834_p3 }
 0x12c   : > { %p542_p6 = por %p541_p1, %p540_p12 }
 0x12d   : > { %p538_p5 = pneg %p537_p11 }
 0x12f   : > { %p543_p13 = pnand %p542_p6, %p538_p5 }
 0x131   : > { %546 = shalt.err (!%p543_p13)
}
 0x132   : > { %412 = dma.vmem_to_hbm [thread:$0]  (%p834_p3), %s775_s28, 256, %s301_s29, %s289_s30  }
 0x133 PF: > { %s315_s25 = sand.u32 1, %s577_s9   ;;  %p835_p7 = scmp.ne.s32.totalorder %s825_s22, 0 }
 0x134   : > { %p836_p8 = scmp.ge.s32.totalorder %s589_s12, 2  ;;  %s316_s26 = scalar_lea.sflag [#allocation4], %s315_s25 }
 0x136   : > { %p423_p9 = pnand %p836_p8, %p835_p7 }
 0x138   : > { %p424_p10 = pneg %p423_p9 }
 0x13a   : > { %572 = dma.done.wait (%p424_p10), %s316_s26, 256  }
 0x13b   : > { %574 = vsyncadd (%p424_p10), %s316_s26, 4294967040  ;;  %p16_p2 = scmp.ge.s32.totalorder %s638_s15, 4   ;;  %s837_s9 = smov %s581_s10 }
 0x13c   : > { %s838_s10 = smov %s585_s11  ;;  %s839_s11 = smov %s650_s18 }
 0x13d   : > { %s840_s12 = smov %s638_s15  ;;  %18 = sbr.rel (!%p16_p2) target bundleno = 6 (0x6), region = 78 }
 0x142   :  { %321 = vsyncpa [#allocation3], 1 }
 0x143   :  { %323 = vsyncpa [#allocation3 + $0x1], 1 }
 0x144   :  { %324 = vsyncpa [#allocation6], 1 }
 0x145   :  { %326 = vsyncpa [#allocation6 + $0x1], 1 }
 0x146   :  { %327 = vsyncpa [#allocation4], 1 }
 0x147   :  { %329 = vsyncpa [#allocation4 + $0x1], 1 }

</bundles_post_ra>
